<compile_context>
chip_gen: v6e
topology: v6e:2x2x1
jax: 0.10.0
libtpu: 0.0.40
codegen_flags: <defaults>
</compile_context>

<pallas_src>
import math
from functools import partial

import numpy as np
import jax
import jax.numpy as jnp
from jax.experimental import pallas as pl
from jax.experimental.pallas import tpu as pltpu
from jax.scipy.special import erf as _erf

# ---------------- configuration (small shapes consistent with the module) ----------------
B, T = 1, 2          # batch, temporal
H = W = 8            # spatial
C = 32               # embed_dim
WS = 4               # win_size
GAMMA = 8            # gamma of LearnedPosMap (must divide C)
N = WS * WS          # tokens per window
EPS = 1e-5           # nn.LayerNorm eps
SQRT2 = np.float32(np.sqrt(2.0))

assert C % GAMMA == 0 and N % 8 == 0 and C % 8 == 0

# ---- static row layout of the packed constant slab ----
ROW_PM = 0                    # (N, GAMMA*N)   posmap
ROW_MG = ROW_PM + N           # (GAMMA, wb*C)  gamma/channel mask
ROW_TB = ROW_MG + GAMMA       # (N, wb*C)      token bias, pre-broadcast
ROW_W1 = ROW_TB + N           # (C, 2*C)       fc1 weight (LN affine folded in)
ROW_B1 = ROW_W1 + C           # (1, 2*C)       fc1 bias   (LN affine folded in)
ROW_B2 = ROW_B1 + 1           # (1, wb*C)      fc2 bias (tiled per window)
CS_ROWS = ((ROW_B2 + 1 + 7) // 8) * 8


def gelu_exact(x):
    # nn.GELU() default (erf-based, not tanh approximation)
    return x * 0.5 * (1.0 + _erf(x / SQRT2))


def relative_position_index(ws):
    # replicates LearnedPosMap.rel_locl_init
    coords = np.stack(np.meshgrid(np.arange(ws), np.arange(ws), indexing="ij"))
    cf = coords.reshape(2, -1)
    rel = cf[:, :, None] - cf[:, None, :]
    rel = rel.transpose(1, 2, 0).astype(np.int64)
    rel[:, :, 0] += ws - 1
    rel[:, :, 1] += ws - 1
    rel[:, :, 0] *= 2 * ws - 1
    return rel.sum(-1)  # (N, N)


REL_INDEX = relative_position_index(WS)                                # (N, N) int


# ---------------- window partition / reverse (glue) ----------------
def window_partition(x, wh, ww):
    b, h, w, c = x.shape
    x = x.reshape(b, h // wh, wh, w // ww, ww, c)
    x = x.transpose(0, 1, 3, 2, 4, 5)
    return x.reshape(b, -1, wh * ww, c)


def window_reverse(x, h, w):
    b, nw, n, c = x.shape
    wh = int(math.sqrt(n))
    ww = wh
    x = x.reshape(b, h // wh, w // ww, wh, ww, c)
    x = x.transpose(0, 1, 3, 2, 4, 5)
    return x.reshape(b, h, w, c)


# ---------------- Pallas kernel: wb windows per grid step ----------------
def posmlp_chunk_kernel(x_ref, w2bd_ref, cs_ref, o_ref, *, wb):
    wbC = wb * C
    # ---- unpack constants from the packed slab (static slices, no runtime cost) ----
    pm = cs_ref[ROW_PM:ROW_PM + N, 0:GAMMA * N]            # (N, GAMMA*N)
    mg = cs_ref[ROW_MG:ROW_MG + GAMMA, 0:wbC]              # (GAMMA, wbC)
    tbb = cs_ref[ROW_TB:ROW_TB + N, 0:wbC]                 # (N, wbC) token bias
    w1f = cs_ref[ROW_W1:ROW_W1 + C, 0:2 * C]               # (C, 2C)
    b1f = cs_ref[ROW_B1:ROW_B1 + 1, 0:2 * C]               # (1, 2C)
    b2t = cs_ref[ROW_B2:ROW_B2 + 1, 0:wbC]                 # (1, wbC)

    x = x_ref[...]                                         # (wb*N, C) rows=(w,n)
    # LayerNorm statistics only (affine folded into w1f/b1f host-side) -- exact
    mean = jnp.mean(x, axis=-1, keepdims=True)
    xc = x - mean
    var = jnp.mean(xc * xc, axis=-1, keepdims=True)
    y = xc * jax.lax.rsqrt(var + EPS)
    # fused fc1 (C -> 2C) + exact GELU, split into the two PoSGU chunks
    z = gelu_exact(jnp.dot(y, w1f, preferred_element_type=jnp.float32) + b1f)
    u = z[:, :C]                                           # (wb*N, C)
    v = z[:, C:]                                           # (wb*N, C)

    # move the window axis from sublanes to lanes: (wb*N, C) -> (N, wb*C)
    u_l = jnp.concatenate([u[w * N:(w + 1) * N, :] for w in range(wb)], axis=1)
    v_l = jnp.concatenate([v[w * N:(w + 1) * N, :] for w in range(wb)], axis=1)

    # LearnedPosMap as ONE lane-dense matmul:
    #   ustk[s*N + n, w*C + c] = u[w, n, c] * (c % gamma == s)
    #   mixed[m, w*C + c]      = sum_{s,n} posmap[s, m, n] * ustk[s*N+n, w*C+c]
    ustk = jnp.concatenate([u_l * mg[s:s + 1, :] for s in range(GAMMA)], axis=0)
    mixed = jnp.dot(pm, ustk, preferred_element_type=jnp.float32) + tbb   # (N, wbC)

    # gate, then fc2 as a window-block-diagonal weight -> lane-dense output
    g = mixed * v_l
    out = jnp.dot(g, w2bd_ref[...], preferred_element_type=jnp.float32) + b2t
    o_ref[...] = out.astype(o_ref.dtype)                   # (N, wbC) dense store


# ---------------- host-side constant packing ----------------
def _build_consts(params, wb):
    wbC = wb * C
    csw = max(GAMMA * N, wbC)                              # slab width (>= 2*C)

    # Fold the LayerNorm affine into fc1 (exact rewrite).
    w1f = params["ln_w"].reshape(C, 1) * params["w1"]      # (C, 2C)
    b1f = params["b1"] + params["ln_b"] @ params["w1"]     # (1, 2C)

    # posmap[s, m, n] = bias_table[rel_index[m, n], s];  pm_cat[m, s*N+n]
    posmap = params["bias_table"][REL_INDEX.reshape(-1)].reshape(N, N, GAMMA)
    posmap = jnp.transpose(posmap, (2, 0, 1))              # (GAMMA, N, N)
    pm_cat = jnp.transpose(posmap, (1, 0, 2)).reshape(N, GAMMA * N)   # (N, GAMMA*N)

    # gamma/channel mask over the lane-stacked axis (C % GAMMA == 0 so the
    # window offset w*C does not change c % GAMMA).
    maskg = (jnp.arange(wbC)[None, :] % GAMMA ==
             jnp.arange(GAMMA)[:, None]).astype(jnp.float32)          # (GAMMA, wbC)

    tbb = jnp.broadcast_to(params["tok_bias"], (N, wbC))   # token bias pre-broadcast
    b2t = jnp.tile(params["b2"], (1, wb))                  # (1, wbC)

    def padw(a):
        return jnp.pad(a, ((0, 0), (0, csw - a.shape[1])))

    cs = jnp.concatenate([
        padw(pm_cat),                                      # rows [ROW_PM, ROW_MG)
        padw(maskg),                                       # rows [ROW_MG, ROW_TB)
        padw(tbb),                                         # rows [ROW_TB, ROW_W1)
        padw(w1f),                                         # rows [ROW_W1, ROW_B1)
        padw(b1f),                                         # row  ROW_B1
        padw(b2t),                                         # row  ROW_B2
        jnp.zeros((CS_ROWS - (ROW_B2 + 1), csw), jnp.float32),
    ], axis=0)                                             # (CS_ROWS, csw)

    # fc2 as a window-block-diagonal weight so the output stays lane-dense.
    eye = jnp.eye(wb, dtype=jnp.float32)
    w2bd = (eye[:, None, :, None] * params["w2"][None, :, None, :]
            ).reshape(wbC, wbC)
    return cs, w2bd


def _pick_chunks(total_w):
    # 2 grid chunks only on chips with 2 TensorCores behind one device
    # (v7x, v4/v5p megacore); single-TC v5e/v6e run one big step.
    try:
        kind = jax.devices()[0].device_kind.lower()
    except Exception:
        kind = ""
    two_core = any(t in kind for t in ("v7", "7x", "v4", "v5p"))
    return 2 if (two_core and total_w % 2 == 0 and total_w >= 2) else 1


# ---------------- wrapper ----------------
@partial(jax.jit, static_argnames=("n_chunks",))
def _posmlp_forward_impl(x, params, *, n_chunks):
    b, t, h, w, c = x.shape
    bt = b * t
    xw = window_partition(x.reshape(bt, h, w, c), WS, WS)   # (bt, nW, N, C)
    n_w = xw.shape[1]
    total_w = bt * n_w
    wb = total_w // n_chunks
    wbC = wb * C
    xf = xw.reshape(total_w * N, C)                          # row-layout tokens

    cs, w2bd = _build_consts(params, wb)

    const = lambda i: (0, 0)
    out_lane = pl.pallas_call(
        partial(posmlp_chunk_kernel, wb=wb),
        out_shape=jax.ShapeDtypeStruct((N, total_w * C), jnp.float32),
        grid_spec=pltpu.PrefetchScalarGridSpec(
            num_scalar_prefetch=0,
            grid=(n_chunks,),
            in_specs=[
                pl.BlockSpec((wb * N, C), lambda i: (i, 0)),     # tokens (row layout)
                pl.BlockSpec((wbC, wbC), const),                 # block-diag fc2 weight
                pl.BlockSpec(cs.shape, const),                   # packed constants slab
            ],
            out_specs=pl.BlockSpec((N, wbC), lambda i: (0, i)),  # lane-dense output
        ),
        compiler_params=pltpu.CompilerParams(
            dimension_semantics=("parallel",)),
    )(xf, w2bd, cs)

    # un-permute the lane-stacked output back to windows, then reverse windows
    out = out_lane.reshape(N, total_w, C).transpose(1, 0, 2).reshape(bt, n_w, N, C)
    out = window_reverse(out, h, w)
    return out.reshape(b, t, h, w, c)


def posmlp_level_forward(x, params):
    b, t, h, w, _ = x.shape
    total_w = (b * t) * (h // WS) * (w // WS)
    return _posmlp_forward_impl(x, params, n_chunks=_pick_chunks(total_w))


# ---------------- pure-JAX reference (correctness check) ----------------
def posmlp_level_reference(x, params):
    b, t, h, w, c = x.shape
    bt = b * t
    xw = window_partition(x.reshape(bt, h, w, c), WS, WS)     # (bt, nW, N, C)
    mean = xw.mean(-1, keepdims=True)
    var = ((xw - mean) ** 2).mean(-1, keepdims=True)
    y = (xw - mean) / jnp.sqrt(var + EPS) * params["ln_w"][0] + params["ln_b"][0]
    hi = jax.lax.Precision.HIGHEST
    z = gelu_exact(jnp.einsum("bwnc,cd->bwnd", y, params["w1"], precision=hi)
                   + params["b1"][0])
    u, v = z[..., :C], z[..., C:]
    posmap = params["bias_table"][REL_INDEX.reshape(-1)].reshape(N, N, GAMMA)
    posmap = jnp.transpose(posmap, (2, 0, 1))
    u5 = u.reshape(bt, -1, N, C // GAMMA, GAMMA)
    mixed = jnp.einsum("smn,bwnvs->bwmvs", posmap, u5, precision=hi)
    mixed = mixed + params["tok_bias"].reshape(1, 1, N, 1, 1)
    g = mixed.reshape(bt, -1, N, C) * v
    out = jnp.einsum("bwnc,cd->bwnd", g, params["w2"], precision=hi) + params["b2"][0]
    out = window_reverse(out, h, w)
    return out.reshape(b, t, h, w, c)


# ---------------- deterministic parameter init ----------------
def init_params(key):
    ks = jax.random.split(key, 8)
    scale = 0.1
    return dict(
        ln_w=1.0 + scale * jax.random.normal(ks[6], (1, C), jnp.float32),
        ln_b=scale * jax.random.normal(ks[7], (1, C), jnp.float32),
        w1=scale * jax.random.normal(ks[0], (C, 2 * C), jnp.float32),
        b1=scale * jax.random.normal(ks[1], (1, 2 * C), jnp.float32),
        # window_relative_position_bias_table: ((2*ws-1)**2, gamma)
        bias_table=scale * jax.random.normal(ks[2], ((2 * WS - 1) * (2 * WS - 1), GAMMA),
                                             jnp.float32),
        # token_proj_n_bias: stored as (N, 1) (equivalent to nn.Parameter (1, N, 1))
        tok_bias=scale * jax.random.normal(ks[3], (N, 1), jnp.float32),
        w2=scale * jax.random.normal(ks[4], (C, C), jnp.float32),
        b2=scale * jax.random.normal(ks[5], (1, C), jnp.float32),
    )


if __name__ == "__main__":
    key = jax.random.PRNGKey(0)
    kx, kp = jax.random.split(key)
    x = jax.random.normal(kx, (B, T, H, W, C), jnp.float32)
    params = init_params(kp)

    out = jax.block_until_ready(posmlp_level_forward(x, params))
    ref = jax.block_until_ready(posmlp_level_reference(x, params))
    np.testing.assert_allclose(np.asarray(out), np.asarray(ref), rtol=2e-2, atol=2e-3)
    print("KERNEL_OK")
</pallas_src>

<mosaic_0001>
module attributes {stable_mosaic.version = 11 : i64} {
  func.func @posmlp_chunk_kernel(%arg0: i32, %arg1: memref<128x32xf32, #tpu.memory_space<vmem>>, %arg2: memref<256x256xf32, #tpu.memory_space<vmem>>, %arg3: memref<80x256xf32, #tpu.memory_space<vmem>>, %arg4: memref<16x256xf32, #tpu.memory_space<vmem>>) attributes {dimension_semantics = [#tpu.dimension_semantics<parallel>], iteration_bounds = array<i64: 1>, scalar_prefetch = 0 : i64, scratch_operands = 0 : i64, tpu.core_type = #tpu.core_type<tc>, window_params = [{transform_indices = @transform_0, window_bounds = array<i64: 128, 32>}, {pipeline_mode = #tpu.pipeline_mode<synchronous>, transform_indices = @transform_1, window_bounds = array<i64: 256, 256>}, {pipeline_mode = #tpu.pipeline_mode<synchronous>, transform_indices = @transform_2, window_bounds = array<i64: 80, 256>}, {transform_indices = @transform_3, window_bounds = array<i64: 16, 256>}]} {
    %c0 = arith.constant 0 : index
    %c0_0 = arith.constant 0 : index
    %0 = vector.load %arg3[%c0, %c0_0] : memref<80x256xf32, #tpu.memory_space<vmem>>, vector<16x128xf32>
    %c16 = arith.constant 16 : index
    %c0_1 = arith.constant 0 : index
    %1 = vector.load %arg3[%c16, %c0_1] : memref<80x256xf32, #tpu.memory_space<vmem>>, vector<8x256xf32>
    %c24 = arith.constant 24 : index
    %c0_2 = arith.constant 0 : index
    %2 = vector.load %arg3[%c24, %c0_2] : memref<80x256xf32, #tpu.memory_space<vmem>>, vector<16x256xf32>
    %c40 = arith.constant 40 : index
    %c0_3 = arith.constant 0 : index
    %3 = vector.load %arg3[%c40, %c0_3] : memref<80x256xf32, #tpu.memory_space<vmem>>, vector<32x64xf32>
    %c72 = arith.constant 72 : index
    %c0_4 = arith.constant 0 : index
    %4 = vector.load %arg3[%c72, %c0_4] : memref<80x256xf32, #tpu.memory_space<vmem>>, vector<1x64xf32>
    %c73 = arith.constant 73 : index
    %c0_5 = arith.constant 0 : index
    %5 = vector.load %arg3[%c73, %c0_5] : memref<80x256xf32, #tpu.memory_space<vmem>>, vector<1x256xf32>
    %c0_6 = arith.constant 0 : index
    %c0_7 = arith.constant 0 : index
    %6 = vector.load %arg1[%c0_6, %c0_7] : memref<128x32xf32, #tpu.memory_space<vmem>>, vector<128x32xf32>
    %cst = arith.constant dense<0.000000e+00> : vector<128xf32>
    %7 = vector.multi_reduction <add>, %6, %cst [1] : vector<128x32xf32> to vector<128xf32>
    %8 = vector.shape_cast %7 : vector<128xf32> to vector<128x1xf32>
    %cst_8 = arith.constant 3.200000e+01 : f32
    %9 = vector.broadcast %cst_8 : f32 to vector<128x1xf32>
    %10 = arith.divf %8, %9 : vector<128x1xf32>
    %11 = vector.broadcast %10 : vector<128x1xf32> to vector<128x32xf32>
    %12 = arith.subf %6, %11 : vector<128x32xf32>
    %13 = arith.mulf %12, %12 : vector<128x32xf32>
    %cst_9 = arith.constant dense<0.000000e+00> : vector<128xf32>
    %14 = vector.multi_reduction <add>, %13, %cst_9 [1] : vector<128x32xf32> to vector<128xf32>
    %15 = vector.shape_cast %14 : vector<128xf32> to vector<128x1xf32>
    %cst_10 = arith.constant 3.200000e+01 : f32
    %16 = vector.broadcast %cst_10 : f32 to vector<128x1xf32>
    %17 = arith.divf %15, %16 : vector<128x1xf32>
    %cst_11 = arith.constant 9.99999974E-6 : f32
    %18 = vector.broadcast %cst_11 : f32 to vector<128x1xf32>
    %19 = arith.addf %17, %18 : vector<128x1xf32>
    %20 = math.rsqrt %19 : vector<128x1xf32>
    %21 = vector.broadcast %20 : vector<128x1xf32> to vector<128x32xf32>
    %22 = arith.mulf %12, %21 : vector<128x32xf32>
    %cst_12 = arith.constant dense<0.000000e+00> : vector<128x64xf32>
    %23 = tpu.matmul %22, %3, %cst_12 {dimension_numbers = #tpu.dot_dimension_numbers<[1], [0], [0], [1], [0, 0, 1, 1], [], []>} : vector<128x32xf32>, vector<32x64xf32>, vector<128x64xf32> -> vector<128x64xf32>
    %24 = vector.broadcast %4 : vector<1x64xf32> to vector<128x64xf32>
    %25 = arith.addf %23, %24 : vector<128x64xf32>
    %cst_13 = arith.constant 5.000000e-01 : f32
    %26 = vector.broadcast %cst_13 : f32 to vector<128x64xf32>
    %27 = arith.mulf %25, %26 : vector<128x64xf32>
    %cst_14 = arith.constant 1.41421354 : f32
    %28 = vector.broadcast %cst_14 : f32 to vector<128x64xf32>
    %29 = arith.divf %25, %28 : vector<128x64xf32>
    %30 = math.erf %29 : vector<128x64xf32>
    %cst_15 = arith.constant 1.000000e+00 : f32
    %31 = vector.broadcast %cst_15 : f32 to vector<128x64xf32>
    %32 = arith.addf %31, %30 : vector<128x64xf32>
    %33 = arith.mulf %27, %32 : vector<128x64xf32>
    %34 = vector.extract_strided_slice %33 {offsets = [0, 0], sizes = [128, 32], strides = [1, 1]} : vector<128x64xf32> to vector<128x32xf32>
    %35 = vector.extract_strided_slice %33 {offsets = [0, 32], sizes = [128, 32], strides = [1, 1]} : vector<128x64xf32> to vector<128x32xf32>
    %36 = vector.extract_strided_slice %34 {offsets = [0, 0], sizes = [16, 32], strides = [1, 1]} : vector<128x32xf32> to vector<16x32xf32>
    %37 = vector.extract_strided_slice %34 {offsets = [16, 0], sizes = [16, 32], strides = [1, 1]} : vector<128x32xf32> to vector<16x32xf32>
    %38 = vector.extract_strided_slice %34 {offsets = [32, 0], sizes = [16, 32], strides = [1, 1]} : vector<128x32xf32> to vector<16x32xf32>
    %39 = vector.extract_strided_slice %34 {offsets = [48, 0], sizes = [16, 32], strides = [1, 1]} : vector<128x32xf32> to vector<16x32xf32>
    %40 = vector.extract_strided_slice %34 {offsets = [64, 0], sizes = [16, 32], strides = [1, 1]} : vector<128x32xf32> to vector<16x32xf32>
    %41 = vector.extract_strided_slice %34 {offsets = [80, 0], sizes = [16, 32], strides = [1, 1]} : vector<128x32xf32> to vector<16x32xf32>
    %42 = vector.extract_strided_slice %34 {offsets = [96, 0], sizes = [16, 32], strides = [1, 1]} : vector<128x32xf32> to vector<16x32xf32>
    %43 = vector.extract_strided_slice %34 {offsets = [112, 0], sizes = [16, 32], strides = [1, 1]} : vector<128x32xf32> to vector<16x32xf32>
    %44 = tpu.concatenate %36, %37, %38, %39, %40, %41, %42, %43 in 1 : vector<16x32xf32>, vector<16x32xf32>, vector<16x32xf32>, vector<16x32xf32>, vector<16x32xf32>, vector<16x32xf32>, vector<16x32xf32>, vector<16x32xf32> -> vector<16x256xf32>
    %45 = vector.extract_strided_slice %35 {offsets = [0, 0], sizes = [16, 32], strides = [1, 1]} : vector<128x32xf32> to vector<16x32xf32>
    %46 = vector.extract_strided_slice %35 {offsets = [16, 0], sizes = [16, 32], strides = [1, 1]} : vector<128x32xf32> to vector<16x32xf32>
    %47 = vector.extract_strided_slice %35 {offsets = [32, 0], sizes = [16, 32], strides = [1, 1]} : vector<128x32xf32> to vector<16x32xf32>
    %48 = vector.extract_strided_slice %35 {offsets = [48, 0], sizes = [16, 32], strides = [1, 1]} : vector<128x32xf32> to vector<16x32xf32>
    %49 = vector.extract_strided_slice %35 {offsets = [64, 0], sizes = [16, 32], strides = [1, 1]} : vector<128x32xf32> to vector<16x32xf32>
    %50 = vector.extract_strided_slice %35 {offsets = [80, 0], sizes = [16, 32], strides = [1, 1]} : vector<128x32xf32> to vector<16x32xf32>
    %51 = vector.extract_strided_slice %35 {offsets = [96, 0], sizes = [16, 32], strides = [1, 1]} : vector<128x32xf32> to vector<16x32xf32>
    %52 = vector.extract_strided_slice %35 {offsets = [112, 0], sizes = [16, 32], strides = [1, 1]} : vector<128x32xf32> to vector<16x32xf32>
    %53 = tpu.concatenate %45, %46, %47, %48, %49, %50, %51, %52 in 1 : vector<16x32xf32>, vector<16x32xf32>, vector<16x32xf32>, vector<16x32xf32>, vector<16x32xf32>, vector<16x32xf32>, vector<16x32xf32>, vector<16x32xf32> -> vector<16x256xf32>
    %54 = vector.extract_strided_slice %1 {offsets = [0, 0], sizes = [1, 256], strides = [1, 1]} : vector<8x256xf32> to vector<1x256xf32>
    %55 = vector.broadcast %54 : vector<1x256xf32> to vector<16x256xf32>
    %56 = arith.mulf %44, %55 : vector<16x256xf32>
    %57 = vector.extract_strided_slice %1 {offsets = [1, 0], sizes = [1, 256], strides = [1, 1]} : vector<8x256xf32> to vector<1x256xf32>
    %58 = vector.broadcast %57 : vector<1x256xf32> to vector<16x256xf32>
    %59 = arith.mulf %44, %58 : vector<16x256xf32>
    %60 = vector.extract_strided_slice %1 {offsets = [2, 0], sizes = [1, 256], strides = [1, 1]} : vector<8x256xf32> to vector<1x256xf32>
    %61 = vector.broadcast %60 : vector<1x256xf32> to vector<16x256xf32>
    %62 = arith.mulf %44, %61 : vector<16x256xf32>
    %63 = vector.extract_strided_slice %1 {offsets = [3, 0], sizes = [1, 256], strides = [1, 1]} : vector<8x256xf32> to vector<1x256xf32>
    %64 = vector.broadcast %63 : vector<1x256xf32> to vector<16x256xf32>
    %65 = arith.mulf %44, %64 : vector<16x256xf32>
    %66 = vector.extract_strided_slice %1 {offsets = [4, 0], sizes = [1, 256], strides = [1, 1]} : vector<8x256xf32> to vector<1x256xf32>
    %67 = vector.broadcast %66 : vector<1x256xf32> to vector<16x256xf32>
    %68 = arith.mulf %44, %67 : vector<16x256xf32>
    %69 = vector.extract_strided_slice %1 {offsets = [5, 0], sizes = [1, 256], strides = [1, 1]} : vector<8x256xf32> to vector<1x256xf32>
    %70 = vector.broadcast %69 : vector<1x256xf32> to vector<16x256xf32>
    %71 = arith.mulf %44, %70 : vector<16x256xf32>
    %72 = vector.extract_strided_slice %1 {offsets = [6, 0], sizes = [1, 256], strides = [1, 1]} : vector<8x256xf32> to vector<1x256xf32>
    %73 = vector.broadcast %72 : vector<1x256xf32> to vector<16x256xf32>
    %74 = arith.mulf %44, %73 : vector<16x256xf32>
    %75 = vector.extract_strided_slice %1 {offsets = [7, 0], sizes = [1, 256], strides = [1, 1]} : vector<8x256xf32> to vector<1x256xf32>
    %76 = vector.broadcast %75 : vector<1x256xf32> to vector<16x256xf32>
    %77 = arith.mulf %44, %76 : vector<16x256xf32>
    %78 = tpu.concatenate %56, %59, %62, %65, %68, %71, %74, %77 in 0 : vector<16x256xf32>, vector<16x256xf32>, vector<16x256xf32>, vector<16x256xf32>, vector<16x256xf32>, vector<16x256xf32>, vector<16x256xf32>, vector<16x256xf32> -> vector<128x256xf32>
    %cst_16 = arith.constant dense<0.000000e+00> : vector<16x256xf32>
    %79 = tpu.matmul %0, %78, %cst_16 {dimension_numbers = #tpu.dot_dimension_numbers<[1], [0], [0], [1], [0, 0, 1, 1], [], []>} : vector<16x128xf32>, vector<128x256xf32>, vector<16x256xf32> -> vector<16x256xf32>
    %80 = arith.addf %79, %2 : vector<16x256xf32>
    %81 = arith.mulf %80, %53 : vector<16x256xf32>
    %c0_17 = arith.constant 0 : index
    %c0_18 = arith.constant 0 : index
    %82 = vector.load %arg2[%c0_17, %c0_18] : memref<256x256xf32, #tpu.memory_space<vmem>>, vector<256x256xf32>
    %cst_19 = arith.constant dense<0.000000e+00> : vector<16x256xf32>
    %83 = tpu.matmul %81, %82, %cst_19 {dimension_numbers = #tpu.dot_dimension_numbers<[1], [0], [0], [1], [0, 0, 1, 1], [], []>} : vector<16x256xf32>, vector<256x256xf32>, vector<16x256xf32> -> vector<16x256xf32>
    %84 = vector.broadcast %5 : vector<1x256xf32> to vector<16x256xf32>
    %85 = arith.addf %83, %84 : vector<16x256xf32>
    %c0_20 = arith.constant 0 : index
    %c0_21 = arith.constant 0 : index
    %86 = vector.load %arg4[%c0_20, %c0_21] : memref<16x256xf32, #tpu.memory_space<vmem>>, vector<16x256xf32>
    tpu.vector_store %arg4[%c0_20, %c0_21], %85 {strides = array<i32>} : memref<16x256xf32, #tpu.memory_space<vmem>>, vector<16x256xf32>,
    return
  }
  func.func @transform_0(%arg0: i32) -> (i32, i32) {
    %c0_i32 = arith.constant 0 : i32
    %c0_i32_0 = arith.constant 0 : i32
    return %arg0, %c0_i32 : i32, i32
  }
  func.func @transform_1(%arg0: i32) -> (i32, i32) {
    %c0_i32 = arith.constant 0 : i32
    %c0_i32_0 = arith.constant 0 : i32
    %c0_i32_1 = arith.constant 0 : i32
    return %c0_i32, %c0_i32_0 : i32, i32
  }
  func.func @transform_2(%arg0: i32) -> (i32, i32) {
    %c0_i32 = arith.constant 0 : i32
    %c0_i32_0 = arith.constant 0 : i32
    %c0_i32_1 = arith.constant 0 : i32
    return %c0_i32, %c0_i32_0 : i32, i32
  }
  func.func @transform_3(%arg0: i32) -> (i32, i32) {
    %c0_i32 = arith.constant 0 : i32
    %c0_i32_0 = arith.constant 0 : i32
    return %c0_i32, %arg0 : i32, i32
  }
}

</mosaic_0001>

<bundles_post_ra>
// kernel: _posmlp_forward_impl.1
= control target key start
LH: loop header
LB: loop body
LE: loop exit
PB: predicated region body
PF: predicated region fallthrough
CT: control target
= control target key end

     0   :  { %vm45_vm0 = vcmask 261120   ;;  %s1117_s26 = smov 32   ;;  %s1118_s27 = smov 64   ;;  %vm579_vm1 = vcmask 523264   ;;  %vm582_vm2 = vcmask 785408   ;;  %s1820_s0 = inlined_call_operand.vmem [shape: f32[128,32], index: 0, kind: input, shape index: {}]   ;;  %s1821_s2 = inlined_call_operand.vmem [shape: f32[80,256], index: 2, kind: input, shape index: {}]   ;;  %s1822_s1 = inlined_call_operand.vmem [shape: f32[256,256], index: 1, kind: input, shape index: {}]   ;;  %s1823_s3 = inlined_call_operand.vmem [shape: f32[16,256], index: 3, kind: output, shape index: {}]  }
   0x1   :  { %v29_v0 = vld [vmem:[%s1820_s0] sm:$0xff]  ;;  %v31_v1 = vld [vmem:[%s1820_s0 + $0x10] sm:$0xff]  ;;  %v30_v2 = vld [vmem:[%s1820_s0 + $0x8] sm:$0xff]  ;;  %s1119_s28 = smov 96  }
   0x2   :  { %v46_v3 = vsel %vm45_vm0, %v29_v0, 0.0  ;;  %v52_v4 = vsel %vm45_vm0, %v31_v1, 0.0  ;;  %v32_v5 = vld [vmem:[%s1820_s0 + $0x18] sm:$0xff]  ;;  %v49_v6 = vsel %vm45_vm0, %v30_v2, 0.0  ;;  %v33_v8 = vld [vmem:[%s1820_s0 + $0x20] sm:$0xff]  ;;  %v34_v9 = vld [vmem:[%s1820_s0 + $0x28] sm:$0xff] }
   0x3   :  { %47 = vadd.xlane.f32.xlu0 %v46_v3  ;;  %53 = vadd.xlane.f32.xlu1 %v52_v4  ;;  %v55_v7 = vsel %vm45_vm0, %v32_v5, 0.0  ;;  %v58_v10 = vsel %vm45_vm0, %v33_v8, 0.0  ;;  %v61_v11 = vsel %vm45_vm0, %v34_v9, 0.0  ;;  %v1168_v12 = vld [vmem:[%s1820_s0 + $0x30] sm:$0xff]  ;;  %v1173_v13 = vld [vmem:[%s1820_s0 + $0x38] sm:$0xff]  ;;  %v1182_v16 = vld [vmem:[%s1820_s0 + $0x40] sm:$0xff] }
   0x4   :  { %v64_v14 = vsel %vm45_vm0, %v1168_v12, 0.0  ;;  %v67_v15 = vsel %vm45_vm0, %v1173_v13, 0.0  ;;  %v1187_v17 = vld [vmem:[%s1820_s0 + $0x48] sm:$0xff]  ;;  %v70_v18 = vsel %vm45_vm0, %v1182_v16, 0.0  ;;  %v1196_v20 = vld [vmem:[%s1820_s0 + $0x50] sm:$0xff]  ;;  %v1201_v21 = vld [vmem:[%s1820_s0 + $0x58] sm:$0xff] }
   0x5   :  { %v73_v19 = vsel %vm45_vm0, %v1187_v17, 0.0  ;;  %v76_v22 = vsel %vm45_vm0, %v1196_v20, 0.0  ;;  %v79_v23 = vsel %vm45_vm0, %v1201_v21, 0.0  ;;  %v1210_v24 = vld [vmem:[%s1820_s0 + $0x60] sm:$0xff]  ;;  %v1215_v25 = vld [vmem:[%s1820_s0 + $0x68] sm:$0xff]  ;;  %v1224_v28 = vld [vmem:[%s1820_s0 + $0x70] sm:$0xff] }
   0x6   :  { %v82_v26 = vsel %vm45_vm0, %v1210_v24, 0.0  ;;  %v85_v27 = vsel %vm45_vm0, %v1215_v25, 0.0  ;;  %v1229_v29 = vld [vmem:[%s1820_s0 + $0x78] sm:$0xff]  ;;  %v88_v30 = vsel %vm45_vm0, %v1224_v28, 0.0 }
   0x7   :  { %50 = vadd.xlane.f32.xlu0 %v49_v6  ;;  %56 = vadd.xlane.f32.xlu1 %v55_v7  ;;  %v91_v31 = vsel %vm45_vm0, %v1229_v29, 0.0 }
   0xb   :  { %59 = vadd.xlane.f32.xlu0 %v58_v10  ;;  %62 = vadd.xlane.f32.xlu1 %v61_v11 }
   0xf   :  { %65 = vadd.xlane.f32.xlu0 %v64_v14  ;;  %68 = vadd.xlane.f32.xlu1 %v67_v15 }
  0x13   :  { %71 = vadd.xlane.f32.xlu0 %v70_v18  ;;  %74 = vadd.xlane.f32.xlu1 %v73_v19 }
  0x17   :  { %77 = vadd.xlane.f32.xlu0 %v76_v22  ;;  %80 = vadd.xlane.f32.xlu1 %v79_v23 }
  0x1b   :  { %83 = vadd.xlane.f32.xlu0 %v82_v26  ;;  %86 = vadd.xlane.f32.xlu1 %v85_v27 }
  0x1f   :  { %89 = vadd.xlane.f32.xlu0 %v88_v30  ;;  %92 = vadd.xlane.f32.xlu1 %v91_v31 }
  0x8c   :  { %v48_v32 = vpop.xlane.xlu0 %47  ;;  %v54_v33 = vpop.xlane.xlu1 %53 }
  0x8d   :  { %v95_v34 = vmul.f32 0.03125, %v48_v32  ;;  %v97_v35 = vmul.f32 0.03125, %v54_v33 }
  0x8f   :  { %v1235_v36 = vsub.f32 %v29_v0, %v95_v34  ;;  %v1237_v37 = vsub.f32 %v31_v1, %v97_v35 }
  0x90   :  { %v51_v38 = vpop.xlane.xlu0 %50  ;;  %v57_v39 = vpop.xlane.xlu1 %56 }
  0x91   :  { %v96_v40 = vmul.f32 0.03125, %v51_v38  ;;  %v98_v41 = vmul.f32 0.03125, %v57_v39  ;;  %v127_v42 = vmul.f32 %v1235_v36, %v1235_v36  ;;  %v129_v43 = vmul.f32 %v1237_v37, %v1237_v37 }
  0x93   :  { %v1243_v44 = vsub.f32 %v30_v2, %v96_v40  ;;  %v1245_v45 = vsub.f32 %v32_v5, %v98_v41  ;;  %v143_v46 = vsel %vm45_vm0, %v127_v42, 0.0  ;;  %v149_v49 = vsel %vm45_vm0, %v129_v43, 0.0 }
  0x94   :  { %144 = vadd.xlane.f32.xlu0 %v143_v46  ;;  %v60_v47 = vpop.xlane.xlu0 %59  ;;  %v63_v48 = vpop.xlane.xlu1 %62 }
  0x95   :  { %v99_v50 = vmul.f32 0.03125, %v60_v47  ;;  %v100_v51 = vmul.f32 0.03125, %v63_v48  ;;  %v128_v52 = vmul.f32 %v1243_v44, %v1243_v44  ;;  %v130_v53 = vmul.f32 %v1245_v45, %v1245_v45 }
  0x97   :  { %v1253_v54 = vsub.f32 %v33_v8, %v99_v50  ;;  %v1255_v55 = vsub.f32 %v34_v9, %v100_v51  ;;  %v146_v56 = vsel %vm45_vm0, %v128_v52, 0.0  ;;  %v152_v59 = vsel %vm45_vm0, %v130_v53, 0.0 }
  0x98   :  { %150 = vadd.xlane.f32.xlu0 %v149_v49  ;;  %147 = vadd.xlane.f32.xlu1 %v146_v56  ;;  %v66_v57 = vpop.xlane.xlu0 %65  ;;  %v69_v58 = vpop.xlane.xlu1 %68  ;;  %v23_v56 = vld [vmem:[%s1821_s2 + $0x60] sm:$0xff] }
  0x99   :  { %v101_v60 = vmul.f32 0.03125, %v66_v57  ;;  %v102_v61 = vmul.f32 0.03125, %v69_v58  ;;  %v131_v62 = vmul.f32 %v1253_v54, %v1253_v54  ;;  %v132_v63 = vmul.f32 %v1255_v55, %v1255_v55  ;;  %v22_v57 = vld [vmem:[%s1821_s2 + $0x50] sm:$0xff] }
  0x9b   :  { %v1264_v0 = vsub.f32 %v1168_v12, %v101_v60  ;;  %v1267_v1 = vsub.f32 %v1173_v13, %v102_v61  ;;  %v155_v2 = vsel %vm45_vm0, %v131_v62, 0.0  ;;  %v158_v5 = vsel %vm45_vm0, %v132_v63, 0.0 }
  0x9c   :  { %153 = vadd.xlane.f32.xlu1 %v152_v59  ;;  %156 = vadd.xlane.f32.xlu0 %v155_v2  ;;  %v72_v3 = vpop.xlane.xlu0 %71  ;;  %v75_v4 = vpop.xlane.xlu1 %74 }
  0x9d   :  { %v103_v6 = vmul.f32 0.03125, %v72_v3  ;;  %v104_v7 = vmul.f32 0.03125, %v75_v4  ;;  %v133_v8 = vmul.f32 %v1264_v0, %v1264_v0  ;;  %v134_v9 = vmul.f32 %v1267_v1, %v1267_v1 }
  0x9f   :  { %v1276_v10 = vsub.f32 %v1182_v16, %v103_v6  ;;  %v1279_v11 = vsub.f32 %v1187_v17, %v104_v7  ;;  %v161_v12 = vsel %vm45_vm0, %v133_v8, 0.0  ;;  %v164_v15 = vsel %vm45_vm0, %v134_v9, 0.0 }
  0xa0   :  { %159 = vadd.xlane.f32.xlu1 %v158_v5  ;;  %162 = vadd.xlane.f32.xlu0 %v161_v12  ;;  %v78_v13 = vpop.xlane.xlu0 %77  ;;  %v81_v14 = vpop.xlane.xlu1 %80 }
  0xa1   :  { %v105_v18 = vmul.f32 0.03125, %v78_v13  ;;  %v106_v19 = vmul.f32 0.03125, %v81_v14  ;;  %v135_v22 = vmul.f32 %v1276_v10, %v1276_v10  ;;  %v136_v16 = vmul.f32 %v1279_v11, %v1279_v11 }
  0xa3   :  { %v1288_v23 = vsub.f32 %v1196_v20, %v105_v18  ;;  %v1291_v17 = vsub.f32 %v1201_v21, %v106_v19  ;;  %v167_v26 = vsel %vm45_vm0, %v135_v22, 0.0  ;;  %v170_v31 = vsel %vm45_vm0, %v136_v16, 0.0 }
  0xa4   :  { %165 = vadd.xlane.f32.xlu1 %v164_v15  ;;  %168 = vadd.xlane.f32.xlu0 %v167_v26  ;;  %v84_v27 = vpop.xlane.xlu0 %83  ;;  %v87_v30 = vpop.xlane.xlu1 %86 }
  0xa5   :  { %v107_v32 = vmul.f32 0.03125, %v84_v27  ;;  %v108_v33 = vmul.f32 0.03125, %v87_v30  ;;  %v137_v34 = vmul.f32 %v1288_v23, %v1288_v23  ;;  %v138_v20 = vmul.f32 %v1291_v17, %v1291_v17 }
  0xa7   :  { %v1300_v35 = vsub.f32 %v1210_v24, %v107_v32  ;;  %v1303_v21 = vsub.f32 %v1215_v25, %v108_v33  ;;  %v173_v38 = vsel %vm45_vm0, %v137_v34, 0.0  ;;  %v176_v41 = vsel %vm45_vm0, %v138_v20, 0.0 }
  0xa8   :  { %171 = vadd.xlane.f32.xlu1 %v170_v31  ;;  %174 = vadd.xlane.f32.xlu0 %v173_v38  ;;  %v90_v39 = vpop.xlane.xlu0 %89  ;;  %v93_v40 = vpop.xlane.xlu1 %92 }
  0xa9   :  { %v109_v42 = vmul.f32 0.03125, %v90_v39  ;;  %v110_v43 = vmul.f32 0.03125, %v93_v40  ;;  %v139_v46 = vmul.f32 %v1300_v35, %v1300_v35  ;;  %v140_v24 = vmul.f32 %v1303_v21, %v1303_v21 }
  0xab   :  { %v1312_v47 = vsub.f32 %v1224_v28, %v109_v42  ;;  %v1315_v25 = vsub.f32 %v1229_v29, %v110_v43  ;;  %v179_v48 = vsel %vm45_vm0, %v139_v46, 0.0  ;;  %v182_v49 = vsel %vm45_vm0, %v140_v24, 0.0  ;;  %v25_v28 = vld [vmem:[%s1821_s2 + $0x80] sm:$0xff]  ;;  %v24_v29 = vld [vmem:[%s1821_s2 + $0x70] sm:$0xff] }
  0xac   :  { %177 = vadd.xlane.f32.xlu1 %v176_v41  ;;  %180 = vadd.xlane.f32.xlu0 %v179_v48 }
  0xad   :  { %v141_v50 = vmul.f32 %v1312_v47, %v1312_v47  ;;  %v142_v51 = vmul.f32 %v1315_v25, %v1315_v25  ;;  %1017 = vmatprep.subr.mxu1 %v25_v28 }
  0xae   :  { %1018 = vmatpush3.msra.mxu1 %v25_v28 }
  0xaf   :  { %v185_v52 = vsel %vm45_vm0, %v141_v50, 0.0  ;;  %v188_v53 = vsel %vm45_vm0, %v142_v51, 0.0  ;;  %1019 = vmatprep.subr.mxu1 %v24_v29 }
  0xb0   :  { %183 = vadd.xlane.f32.xlu1 %v182_v49  ;;  %186 = vadd.xlane.f32.xlu0 %v185_v52 }
  0xb1   :  { %1020 = vmatpush3.msra.mxu1 %v24_v29 }
  0xb2   :  { %1021 = vmatprep.subr.mxu1 %v23_v56 }
  0xb3   :  { %1022 = vmatpush3.msra.mxu1 %v23_v56 }
  0xb4   :  { %189 = vadd.xlane.f32.xlu1 %v188_v53  ;;  %1023 = vmatprep.subr.mxu1 %v22_v57 }
  0xb5   :  { %1024 = vmatpush3.msra.mxu1 %v22_v57 }
 0x11d   :  { %v145_v58 = vpop.xlane.xlu0 %144 }
 0x11e   :  { %v191_v59 = vmul.f32 0.03125, %v145_v58 }
 0x120   :  { %v207_v60 = vadd.f32 1e-05, %v191_v59 }
 0x121   :  { %v148_v61 = vpop.xlane.xlu1 %147  ;;  %v151_v62 = vpop.xlane.xlu0 %150 }
 0x122   :  { %1053 = vrsqrt.f32 %v207_v60  ;;  %v192_v63 = vmul.f32 0.03125, %v148_v61  ;;  %v193_v2 = vmul.f32 0.03125, %v151_v62 }
 0x124   :  { %v208_v3 = vadd.f32 1e-05, %v192_v63  ;;  %v209_v4 = vadd.f32 1e-05, %v193_v2 }
 0x125   :  { %v154_v5 = vpop.xlane.xlu1 %153  ;;  %v157_v6 = vpop.xlane.xlu0 %156 }
 0x126   :  { %1055 = vrsqrt.f32 %v208_v3  ;;  %v194_v7 = vmul.f32 0.03125, %v154_v5  ;;  %v195_v8 = vmul.f32 0.03125, %v157_v6 }
 0x127   :  { %1057 = vrsqrt.f32 %v209_v4 }
 0x128   :  { %v210_v9 = vadd.f32 1e-05, %v194_v7  ;;  %v211_v12 = vadd.f32 1e-05, %v195_v8 }
 0x129   :  { %v160_v13 = vpop.xlane.xlu1 %159  ;;  %v163_v14 = vpop.xlane.xlu0 %162 }
 0x12a   :  { %1059 = vrsqrt.f32 %v210_v9  ;;  %v196_v15 = vmul.f32 0.03125, %v160_v13  ;;  %v197_v18 = vmul.f32 0.03125, %v163_v14 }
 0x12b   :  { %1061 = vrsqrt.f32 %v211_v12 }
 0x12c   :  { %v212_v19 = vadd.f32 1e-05, %v196_v15  ;;  %v213_v22 = vadd.f32 1e-05, %v197_v18 }
 0x12d   :  { %v166_v16 = vpop.xlane.xlu1 %165  ;;  %v169_v26 = vpop.xlane.xlu0 %168 }
 0x12e   :  { %1063 = vrsqrt.f32 %v212_v19  ;;  %v198_v27 = vmul.f32 0.03125, %v166_v16  ;;  %v199_v30 = vmul.f32 0.03125, %v169_v26  ;;  %v1374_v16 = vld [vmem:[%s1821_s2 + $0x90] ss:$0 sm:$0xff] }
 0x12f   :  { %v1054_v31 = vpop.eup %1053  ;;  %1065 = vrsqrt.f32 %v213_v22 }
 0x130   :  { %v214_v32 = vadd.f32 1e-05, %v198_v27  ;;  %v215_v33 = vadd.f32 1e-05, %v199_v30  ;;  %v239_v34 = vmul.f32 %v1054_v31, %v1235_v36 }
 0x131   :  { %v172_v20 = vpop.xlane.xlu1 %171  ;;  %v175_v38 = vpop.xlane.xlu0 %174 }
 0x132   :  { %1067 = vrsqrt.f32 %v214_v32  ;;  %v200_v39 = vmul.f32 0.03125, %v172_v20  ;;  %v201_v40 = vmul.f32 0.03125, %v175_v38  ;;  %1025 = vmatprep.mubr.msk.f32.mxu1 %vm45_vm0, %v239_v34 }
 0x133   :  { %v1056_v41 = vpop.eup %1055  ;;  %1069 = vrsqrt.f32 %v215_v33 }
 0x134   :  { %v1058_v42 = vpop.eup %1057  ;;  %v216_v43 = vadd.f32 1e-05, %v200_v39  ;;  %v217_v46 = vadd.f32 1e-05, %v201_v40  ;;  %v240_v24 = vmul.f32 %v1056_v41, %v1243_v44 }
 0x135   :  { %v178_v48 = vpop.xlane.xlu1 %177  ;;  %v181_v49 = vpop.xlane.xlu0 %180  ;;  %v241_v50 = vmul.f32 %v1058_v42, %v1237_v37 }
 0x136   :  { %1071 = vrsqrt.f32 %v216_v43  ;;  %v202_v36 = vmul.f32 0.03125, %v178_v48  ;;  %v203_v51 = vmul.f32 0.03125, %v181_v49  ;;  %1026 = vmatmul.mubr.msk.f32.vlgmr.msra.gmra.mxu1 %vm45_vm0, %v240_v24 }
 0x137   :  { %v1060_v28 = vpop.eup %1059  ;;  %1073 = vrsqrt.f32 %v217_v46  ;;  %1028 = vmatprep.mubr.msk.f32.mxu1 %vm45_vm0, %v241_v50 }
 0x138   :  { %v1062_v52 = vpop.eup %1061  ;;  %v218_v29 = vadd.f32 1e-05, %v202_v36  ;;  %v219_v53 = vadd.f32 1e-05, %v203_v51  ;;  %v242_v56 = vmul.f32 %v1060_v28, %v1245_v45 }
 0x139   :  { %v184_v57 = vpop.xlane.xlu1 %183  ;;  %v187_v44 = vpop.xlane.xlu0 %186  ;;  %v243_v58 = vmul.f32 %v1062_v52, %v1253_v54 }
 0x13a   :  { %1075 = vrsqrt.f32 %v218_v29  ;;  %v204_v37 = vmul.f32 0.03125, %v184_v57  ;;  %v205_v59 = vmul.f32 0.03125, %v187_v44  ;;  %1029 = vmatmul.mubr.msk.f32.gmra.mxu1 %vm45_vm0, %v242_v56 }
 0x13b   :  { %v1064_v60 = vpop.eup %1063  ;;  %1077 = vrsqrt.f32 %v219_v53  ;;  %1031 = vmatprep.mubr.msk.f32.mxu1 %vm45_vm0, %v243_v58 }
 0x13c   :  { %v1066_v61 = vpop.eup %1065  ;;  %v220_v62 = vadd.f32 1e-05, %v204_v37  ;;  %v221_v63 = vadd.f32 1e-05, %v205_v59  ;;  %v244_v2 = vmul.f32 %v1064_v60, %v1255_v55 }
 0x13d   :  { %v190_v3 = vpop.xlane.xlu1 %189  ;;  %v245_v45 = vmul.f32 %v1066_v61, %v1264_v0 }
 0x13e   :  { %1079 = vrsqrt.f32 %v220_v62  ;;  %v206_v4 = vmul.f32 0.03125, %v190_v3  ;;  %1032 = vmatmul.mubr.msk.f32.gmra.mxu1 %vm45_vm0, %v244_v2 }
 0x13f   :  { %v1068_v54 = vpop.eup %1067  ;;  %1081 = vrsqrt.f32 %v221_v63  ;;  %1034 = vmatprep.mubr.msk.f32.mxu1 %vm45_vm0, %v245_v45 }
 0x140   :  { %v1070_v5 = vpop.eup %1069  ;;  %v222_v6 = vadd.f32 1e-05, %v206_v4  ;;  %v246_v7 = vmul.f32 %v1068_v54, %v1267_v1 }
 0x141   :  { %v247_v8 = vmul.f32 %v1070_v5, %v1276_v10 }
 0x142   :  { %1083 = vrsqrt.f32 %v222_v6  ;;  %1035 = vmatmul.mubr.msk.f32.gmra.mxu1 %vm45_vm0, %v246_v7 }
 0x143   :  { %v1072_v55 = vpop.eup %1071  ;;  %1037 = vmatprep.mubr.msk.f32.mxu1 %vm45_vm0, %v247_v8 }
 0x144   :  { %v1074_v0 = vpop.eup %1073  ;;  %v248_v9 = vmul.f32 %v1072_v55, %v1279_v11 }
 0x145   :  { %v249_v12 = vmul.f32 %v1074_v0, %v1288_v23 }
 0x146   :  { %1038 = vmatmul.mubr.msk.f32.gmra.mxu1 %vm45_vm0, %v248_v9 }
 0x147   :  { %v1076_v13 = vpop.eup %1075  ;;  %1040 = vmatprep.mubr.msk.f32.mxu1 %vm45_vm0, %v249_v12 }
 0x148   :  { %v1078_v14 = vpop.eup %1077  ;;  %v250_v1 = vmul.f32 %v1076_v13, %v1291_v17 }
 0x149   :  { %v251_v10 = vmul.f32 %v1078_v14, %v1300_v35 }
 0x14a   :  { %1041 = vmatmul.mubr.msk.f32.gmra.mxu1 %vm45_vm0, %v250_v1 }
 0x14b   :  { %v1080_v15 = vpop.eup %1079  ;;  %1043 = vmatprep.mubr.msk.f32.mxu1 %vm45_vm0, %v251_v10 }
 0x14c   :  { %v1082_v18 = vpop.eup %1081  ;;  %v252_v11 = vmul.f32 %v1080_v15, %v1303_v21 }
 0x14d   :  { %v253_v23 = vmul.f32 %v1082_v18, %v1312_v47 }
 0x14e   :  { %1044 = vmatmul.mubr.msk.f32.gmra.mxu1 %vm45_vm0, %v252_v11 }
 0x14f   :  { %v1084_v19 = vpop.eup %1083  ;;  %1046 = vmatprep.mubr.msk.f32.mxu1 %vm45_vm0, %v253_v23 }
 0x150   :  { %v254_v22 = vmul.f32 %v1084_v19, %v1315_v25 }
 0x152   :  { %1047 = vmatmul.mubr.msk.f32.gmra.mxu1 %vm45_vm0, %v254_v22 }
 0x1f6   :  { %v1369_v17 = vpop.f32.mrf.mxu1 }
 0x1f8   :  { %v369_v35 = vpop.f32.mrf.mxu1 }
 0x1f9   :  { %v1393_v62 = vadd.f32 %v369_v35, %v1374_v16 }
 0x1fa   :  { %v1030_v21 = vpop.f32.mrf.mxu1 }
 0x1fb   :  { %v385_v47 = vadd.f32 %v1030_v21, %v1374_v16  ;;  %v465_v10 = vmul.f32 0.70710677, %v1393_v62 }
 0x1fc   :  { %v379_v26 = vpop.f32.mrf.mxu1 }
 0x1fd   :  { %v468_v27 = vmul.f32 0.70710677, %v385_v47  ;;  %v380_v30 = vadd.f32 %v379_v26, %v1374_v16  ;;  %v451_v52 = vmul.f32 0.5, %v385_v47 }
 0x1fe   :  { %v1033_v31 = vpop.f32.mrf.mxu1 }
 0x1ff   :  { %1085 = verf.f32 %v468_v27  ;;  %v467_v25 = vmul.f32 0.70710677, %v380_v30  ;;  %v395_v32 = vadd.f32 %v1033_v31, %v1374_v16  ;;  %v450_v37 = vmul.f32 0.5, %v380_v30 }
 0x200   :  { %v389_v33 = vpop.f32.mrf.mxu1  ;;  %v375_v31 = vadd.f32 %v1369_v17, %v1374_v16 }
 0x201   :  { %1087 = verf.f32 %v467_v25  ;;  %v470_v34 = vmul.f32 0.70710677, %v395_v32  ;;  %v390_v20 = vadd.f32 %v389_v33, %v1374_v16  ;;  %v453_v45 = vmul.f32 0.5, %v395_v32 }
 0x202   :  { %v1036_v38 = vpop.f32.mrf.mxu1 }
 0x203   :  { %1089 = verf.f32 %v470_v34  ;;  %v469_v39 = vmul.f32 0.70710677, %v390_v20  ;;  %v405_v40 = vadd.f32 %v1036_v38, %v1374_v16  ;;  %v452_v15 = vmul.f32 0.5, %v390_v20 }
 0x204   :  { %v399_v41 = vpop.f32.mrf.mxu1 }
 0x205   :  { %1091 = verf.f32 %v469_v39  ;;  %v472_v42 = vmul.f32 0.70710677, %v405_v40  ;;  %v1386_v29 = vadd.f32 %v399_v41, %v1374_v16  ;;  %v455_v22 = vmul.f32 0.5, %v405_v40 }
 0x206   :  { %v1039_v43 = vpop.f32.mrf.mxu1  ;;  %v466_v41 = vmul.f32 0.70710677, %v375_v31 }
 0x207   :  { %1093 = verf.f32 %v472_v42  ;;  %v471_v4 = vmul.f32 0.70710677, %v1386_v29  ;;  %v415_v35 = vadd.f32 %v1039_v43, %v1374_v16 }
 0x208   :  { %v409_v46 = vpop.f32.mrf.mxu1 }
 0x209   :  { %v1402_v7 = vadd.f32 %v409_v46, %v1374_v16  ;;  %v474_v25 = vmul.f32 0.70710677, %v415_v35 }
 0x20a   :  { %v1042_v24 = vpop.f32.mrf.mxu1 }
 0x20b   :  { %v425_v48 = vadd.f32 %v1042_v24, %v1374_v16  ;;  %v473_v18 = vmul.f32 0.70710677, %v1402_v7 }
 0x20c   :  { %v1086_v49 = vpop.eup %1085  ;;  %v419_v50 = vpop.f32.mrf.mxu1 }
 0x20d   :  { %v476_v36 = vmul.f32 0.70710677, %v425_v48  ;;  %v1383_v51 = vadd.f32 %v419_v50, %v1374_v16  ;;  %v500_v56 = vadd.f32 1.0, %v1086_v49  ;;  %v459_v26 = vmul.f32 0.5, %v425_v48 }
 0x20e   :  { %v1088_v28 = vpop.eup %1087  ;;  %v1045_v53 = vpop.f32.mrf.mxu1 }
 0x20f   :  { %1095 = verf.f32 %v476_v36  ;;  %v475_v57 = vmul.f32 0.70710677, %v1383_v51  ;;  %v435_v44 = vadd.f32 %v1045_v53, %v1374_v16  ;;  %v1390_v60 = vmul.f32 %v500_v56, %v451_v52 }
 0x210   :  { %v1090_v58 = vpop.eup %1089  ;;  %v429_v59 = vpop.f32.mrf.mxu1  ;;  %v499_v61 = vadd.f32 1.0, %v1088_v28  ;;  %v458_v20 = vmul.f32 0.5, %v1383_v51 }
 0x211   :  { %1097 = verf.f32 %v475_v57  ;;  %v478_v63 = vmul.f32 0.70710677, %v435_v44  ;;  %v430_v2 = vadd.f32 %v429_v59, %v1374_v16  ;;  %533 = vrot.lane.b32.xlu1 %v1390_v60, %s1117_s26  ;;  %v502_v6 = vadd.f32 1.0, %v1090_v58 }
 0x212   :  { %v1092_v3 = vpop.eup %1091  ;;  %v1048_v54 = vpop.f32.mrf.mxu1  ;;  %v1399_v5 = vmul.f32 %v499_v61, %v450_v37  ;;  %v461_v38 = vmul.f32 0.5, %v435_v44  ;;  %v454_v57 = vmul.f32 0.5, %v1386_v29 }
 0x213   :  { %1099 = verf.f32 %v478_v63  ;;  %v477_v8 = vmul.f32 0.70710677, %v430_v2  ;;  %v445_v55 = vadd.f32 %v1048_v54, %v1374_v16  ;;  %v1407_v9 = vmul.f32 %v502_v6, %v453_v45 }
 0x214   :  { %531 = vrot.lane.b32.xlu0 %v1399_v5, %s1117_s26  ;;  %v439_v0 = vpop.f32.mrf.mxu1  ;;  %v501_v12 = vadd.f32 1.0, %v1092_v3  ;;  %v1094_v13 = vpop.eup %1093  ;;  %v460_v24 = vmul.f32 0.5, %v430_v2  ;;  %v448_v63 = vmul.f32 0.5, %v1393_v62  ;;  %v456_v2 = vmul.f32 0.5, %v1402_v7 }
 0x215   :  { %1101 = verf.f32 %v477_v8  ;;  %v480_v14 = vmul.f32 0.70710677, %v445_v55  ;;  %v440_v1 = vadd.f32 %v439_v0, %v1374_v16  ;;  %541 = vrot.lane.b32.xlu1 %v1407_v9, %s1118_s27  ;;  %v504_v19 = vadd.f32 1.0, %v1094_v13  ;;  %v850_v13 = vld [vmem:[%s1822_s1 + $0xf0] sm:$0xff] }
 0x216   :  { %1103 = verf.f32 %v471_v4  ;;  %v1414_v23 = vmul.f32 %v501_v12, %v452_v15  ;;  %v463_v48 = vmul.f32 0.5, %v445_v55  ;;  %v457_v62 = vmul.f32 0.5, %v415_v35  ;;  %v851_v12 = vld [vmem:[%s1822_s1 + $0xf8] sm:$0xff]  ;;  %v845_v15 = vld [vmem:[%s1822_s1 + $0xc8] sm:$0xff] }
 0x217   :  { %1105 = verf.f32 %v480_v14  ;;  %v479_v11 = vmul.f32 0.70710677, %v440_v1  ;;  %v1419_v47 = vmul.f32 %v504_v19, %v455_v22  ;;  %v462_v44 = vmul.f32 0.5, %v440_v1  ;;  %895 = vmatprep.subr.mxu0 %v851_v12  ;;  %v848_v14 = vld [vmem:[%s1822_s1 + $0xe0] sm:$0xff]  ;;  %v847_v1 = vld [vmem:[%s1822_s1 + $0xd8] sm:$0xff]  ;;  %v841_v19 = vld [vmem:[%s1822_s1 + $0xa8] sm:$0xff] }
 0x218   :  { %v449_v8 = vmul.f32 0.5, %v375_v31  ;;  %v1120_v0 = vmov 0.0   ;;  %896 = vmatpush1.msra.mxu0 %v850_v13  ;;  %v840_v22 = vld [vmem:[%s1822_s1 + $0xa0] sm:$0xff]  ;;  %v839_v35 = vld [vmem:[%s1822_s1 + $0x98] sm:$0xff]  ;;  %v833_v31 = vld [vmem:[%s1822_s1 + $0x68] sm:$0xff] }
 0x219   :  { %1107 = verf.f32 %v479_v11  ;;  %539 = vrot.lane.b32.xlu1 %v1414_v23, %s1118_s27  ;;  %803 = vmatprep.mubr.f32.mxu1 %v1120_v0  ;;  %v843_v11 = vld [vmem:[%s1822_s1 + $0xb8] sm:$0xff]  ;;  %v860_v12 = vld [vmem:[%s1822_s1 + $0x140] sm:$0xff] }
 0x21a   :  { %1109 = verf.f32 %v465_v10  ;;  %v846_v10 = vld [vmem:[%s1822_s1 + $0xd0] sm:$0xff] }
 0x21b   :  { %1111 = verf.f32 %v473_v18  ;;  %v844_v18 = vld [vmem:[%s1822_s1 + $0xc0] sm:$0xff] }
 0x21c   :  { %v1096_v21 = vpop.eup %1095  ;;  %1113 = verf.f32 %v474_v25  ;;  %v832_v25 = vld [vmem:[%s1822_s1 + $0x60] sm:$0xff] }
 0x21d   :  { %v508_v27 = vadd.f32 1.0, %v1096_v21  ;;  %549 = vrot.lane.b32.xlu1 %v1419_v47, %s1119_s28  ;;  %1115 = verf.f32 %v466_v41  ;;  %v838_v21 = vld [vmem:[%s1822_s1 + $0x90] sm:$0xff]  ;;  %v825_v41 = vld [vmem:[%s1822_s1 + $0x28] sm:$0xff] }
 0x21e   :  { %v1098_v30 = vpop.eup %1097 }
 0x21f   :  { %v1425_v32 = vmul.f32 %v508_v27, %v459_v26  ;;  %v507_v33 = vadd.f32 1.0, %v1098_v30  ;;  %v836_v26 = vld [vmem:[%s1822_s1 + $0x80] sm:$0xff]  ;;  %v835_v27 = vld [vmem:[%s1822_s1 + $0x78] sm:$0xff]  ;;  %v834_v30 = vld [vmem:[%s1822_s1 + $0x70] sm:$0xff] }
 0x220   :  { %v1100_v34 = vpop.eup %1099 }
 0x221   :  { %557 = vrot.lane.b32.xlu0 %v1425_v32, %s1117_s26  ;;  %v510_v39 = vadd.f32 1.0, %v1100_v34  ;;  %v1430_v17 = vmul.f32 %v507_v33, %v458_v20  ;;  %v831_v33 = vld [vmem:[%s1822_s1 + $0x58] sm:$0xff]  ;;  %v830_v34 = vld [vmem:[%s1822_s1 + $0x50] sm:$0xff]  ;;  %v829_v20 = vld [vmem:[%s1822_s1 + $0x48] sm:$0xff] }
 0x222   :  { %v1102_v40 = vpop.eup %1101 }
 0x223   :  { %v1104_v42 = vpop.eup %1103  ;;  %v526_v16 = vmul.f32 %v510_v39, %v461_v38  ;;  %v509_v43 = vadd.f32 1.0, %v1102_v40  ;;  %v828_v38 = vld [vmem:[%s1822_s1 + $0x40] sm:$0xff]  ;;  %v827_v39 = vld [vmem:[%s1822_s1 + $0x38] sm:$0xff]  ;;  %v826_v40 = vld [vmem:[%s1822_s1 + $0x30] sm:$0xff] }
 0x224   :  { %v1106_v46 = vpop.eup %1105  ;;  %v503_v52 = vadd.f32 1.0, %v1104_v42  ;;  %v824_v42 = vld [vmem:[%s1822_s1 + $0x20] sm:$0xff] }
 0x225   :  { %555 = vrot.lane.b32.xlu0 %v1430_v17, %s1117_s26  ;;  %565 = vrot.lane.b32.xlu1 %v526_v16, %s1118_s27  ;;  %v512_v49 = vadd.f32 1.0, %v1106_v46  ;;  %v525_v51 = vmul.f32 %v509_v43, %v460_v24  ;;  %v822_v43 = vld [vmem:[%s1822_s1 + $0x10] sm:$0xff]  ;;  %v821_v46 = vld [vmem:[%s1822_s1 + $0x8] sm:$0xff] }
 0x226   :  { %v1108_v50 = vpop.eup %1107  ;;  %v519_v58 = vmul.f32 %v503_v52, %v454_v57  ;;  %v820_v24 = vld [vmem:[%s1822_s1] sm:$0xff]  ;;  %v877_v52 = vld [vmem:[%s1822_s1 + $0x1c8] sm:$0xff]  ;;  %v874_v57 = vld [vmem:[%s1822_s1 + $0x1b0] sm:$0xff] }
 0x227   :  { %v1110_v36 = vpop.eup %1109  ;;  %v528_v28 = vmul.f32 %v512_v49, %v463_v48  ;;  %v511_v53 = vadd.f32 1.0, %v1108_v50  ;;  %v883_v48 = vld [vmem:[%s1822_s1 + $0x1f8] sm:$0xff]  ;;  %v882_v49 = vld [vmem:[%s1822_s1 + $0x1f0] sm:$0xff]  ;;  %v881_v50 = vld [vmem:[%s1822_s1 + $0x1e8] sm:$0xff] }
 0x228   :  { %v1112_v56 = vpop.eup %1111  ;;  %v497_v59 = vadd.f32 1.0, %v1110_v36  ;;  %v880_v36 = vld [vmem:[%s1822_s1 + $0x1e0] sm:$0xff] }
 0x229   :  { %563 = vrot.lane.b32.xlu0 %v525_v51, %s1118_s27  ;;  %573 = vrot.lane.b32.xlu1 %v528_v28, %s1119_s28  ;;  %v527_v37 = vmul.f32 %v511_v53, %v462_v44  ;;  %v505_v61 = vadd.f32 1.0, %v1112_v56  ;;  %v1114_v45 = vpop.eup %1113  ;;  %v876_v53 = vld [vmem:[%s1822_s1 + $0x1c0] sm:$0xff]  ;;  %v875_v56 = vld [vmem:[%s1822_s1 + $0x1b8] sm:$0xff] }
 0x22a   :  { %v1442_v3 = vmul.f32 %v497_v59, %v448_v63  ;;  %v1116_v4 = vpop.eup %1115  ;;  %v506_v54 = vadd.f32 1.0, %v1114_v45  ;;  %v873_v44 = vld [vmem:[%s1822_s1 + $0x1a8] sm:$0xff]  ;;  %v870_v59 = vld [vmem:[%s1822_s1 + $0x190] sm:$0xff]  ;;  %v868_v63 = vld [vmem:[%s1822_s1 + $0x180] sm:$0xff] }
 0x22b   :  { %v1444_v29 = vmul.f32 %v505_v61, %v456_v2  ;;  %v498_v7 = vadd.f32 1.0, %v1116_v4  ;;  %v869_v61 = vld [vmem:[%s1822_s1 + $0x188] sm:$0xff]  ;;  %v867_v2 = vld [vmem:[%s1822_s1 + $0x178] sm:$0xff]  ;;  %v866_v45 = vld [vmem:[%s1822_s1 + $0x170] sm:$0xff] }
 0x22c   :  { %v1453_v6 = vmul.f32 %v506_v54, %v457_v62  ;;  %v865_v4 = vld [vmem:[%s1822_s1 + $0x168] sm:$0xff]  ;;  %v864_v54 = vld [vmem:[%s1822_s1 + $0x160] sm:$0xff]  ;;  %v863_v62 = vld [vmem:[%s1822_s1 + $0x158] sm:$0xff] }
 0x22d   :  { %547 = vrot.lane.b32.xlu1 %v519_v58, %s1119_s28  ;;  %571 = vrot.lane.b32.xlu0 %v527_v37, %s1119_s28  ;;  %v1458_v55 = vmul.f32 %v498_v7, %v449_v8  ;;  %v862_v7 = vld [vmem:[%s1822_s1 + $0x150] sm:$0xff]  ;;  %v861_v8 = vld [vmem:[%s1822_s1 + $0x148] sm:$0xff] }
 0x231   :  { %593 = vrot.lane.b32.xlu1 %v1442_v3, %s1119_s28  ;;  %613 = vrot.lane.b32.xlu0 %v1444_v29, %s1119_s28 }
 0x235   :  { %599 = vrot.lane.b32.xlu1 %v1414_v23, %s1117_s26  ;;  %619 = vrot.lane.b32.xlu0 %v525_v51, %s1117_s26  ;;  %v842_v23 = vld [vmem:[%s1822_s1 + $0xb0] sm:$0xff]  ;;  %v879_v51 = vld [vmem:[%s1822_s1 + $0x1d8] sm:$0xff] }
 0x239   :  { %605 = vrot.lane.b32.xlu1 %v519_v58, %s1118_s27  ;;  %615 = vrot.lane.b32.xlu0 %v1453_v6, %s1119_s28  ;;  %v872_v58 = vld [vmem:[%s1822_s1 + $0x1a0] sm:$0xff] }
 0x23d   :  { %595 = vrot.lane.b32.xlu1 %v1458_v55, %s1119_s28  ;;  %621 = vrot.lane.b32.xlu0 %v526_v16, %s1117_s26  ;;  %v823_v16 = vld [vmem:[%s1822_s1 + $0x18] sm:$0xff] }
 0x241   :  { %601 = vrot.lane.b32.xlu1 %v1407_v9, %s1117_s26  ;;  %625 = vrot.lane.b32.xlu0 %v527_v37, %s1118_s27  ;;  %v849_v9 = vld [vmem:[%s1822_s1 + $0xe8] sm:$0xff]  ;;  %v871_v37 = vld [vmem:[%s1822_s1 + $0x198] sm:$0xff] }
 0x242   :  { %897 = vmatprep.subr.mxu0 %v849_v9 }
 0x243   :  { %898 = vmatpush1.msra.mxu0 %v848_v14 }
 0x244   :  { %899 = vmatprep.subr.mxu0 %v847_v1  ;;  %v643_v1 = vlaneseq }
 0x245   :  { %607 = vrot.lane.b32.xlu1 %v1419_v47, %s1118_s27  ;;  %627 = vrot.lane.b32.xlu0 %v528_v28, %s1118_s27  ;;  %v837_v47 = vld [vmem:[%s1822_s1 + $0x88] sm:$0xff]  ;;  %v878_v28 = vld [vmem:[%s1822_s1 + $0x1d0] sm:$0xff] }
 0x246   :  { %900 = vmatpush1.msra.mxu0 %v846_v10 }
 0x247   :  { %901 = vmatprep.subr.mxu0 %v845_v15  ;;  %v1638_v15 = vshrl.u32 %v643_v1, 7 }
 0x248   :  { %902 = vmatpush1.msra.mxu0 %v844_v18 }
 0x249   :  { %903 = vmatprep.subr.mxu0 %v843_v11 }
 0x24a   :  { %904 = vmatpush1.msra.mxu0 %v842_v23  ;;  %v1643_v23 = vld [vmem:[%s1821_s2 + $0x28] sm:$0xff] }
 0x24b   :  { %905 = vmatprep.subr.mxu0 %v841_v19  ;;  %v729_v19 = vsub.s32 7, %v1638_v15 }
 0x24c   :  { %906 = vmatpush1.msra.mxu0 %v840_v22 }
 0x24d   :  { %907 = vmatprep.subr.mxu0 %v839_v35 }
 0x24e   :  { %908 = vmatpush1.msra.mxu0 %v838_v21  ;;  %v1649_v21 = vld [vmem:[%s1821_s2 + $0x20] sm:$0xff] }
 0x24f   :  { %909 = vmatprep.subr.mxu0 %v837_v47 }
 0x250   :  { %910 = vmatpush1.msra.mxu0 %v836_v26  ;;  %v734_v26 = vrot.slane %v1643_v23, %v729_v19 }
 0x251   :  { %911 = vmatprep.subr.mxu0 %v835_v27 }
 0x252   :  { %912 = vmatpush1.msra.mxu0 %v834_v30 }
 0x253   :  { %913 = vmatprep.subr.mxu0 %v833_v31  ;;  %v730_v31 = vrot.slane %v1649_v21, %v729_v19 }
 0x254   :  { %914 = vmatpush1.msra.mxu0 %v832_v25 }
 0x255   :  { %915 = vmatprep.subr.mxu0 %v831_v33 }
 0x256   :  { %916 = vmatpush1.msra.mxu0 %v830_v34 }
 0x257   :  { %917 = vmatprep.subr.mxu0 %v829_v20 }
 0x258   :  { %918 = vmatpush1.msra.mxu0 %v828_v38 }
 0x259   :  { %919 = vmatprep.subr.mxu0 %v827_v39 }
 0x25a   :  { %920 = vmatpush1.msra.mxu0 %v826_v40 }
 0x25b   :  { %921 = vmatprep.subr.mxu0 %v825_v41 }
 0x25c   :  { %922 = vmatpush1.msra.mxu0 %v824_v42 }
 0x25d   :  { %923 = vmatprep.subr.mxu0 %v823_v16 }
 0x25e   :  { %924 = vmatpush1.msra.mxu0 %v822_v43 }
 0x25f   :  { %925 = vmatprep.subr.mxu0 %v821_v46 }
 0x260   :  { %926 = vmatpush1.msra.mxu0 %v820_v24 }
 0x261   :  { %927 = vmatprep.subr.mxu0 %v883_v48 }
 0x262   :  { %928 = vmatpush2.msra.mxu0 %v882_v49 }
 0x263   :  { %929 = vmatprep.subr.mxu0 %v881_v50 }
 0x264   :  { %930 = vmatpush2.msra.mxu0 %v880_v36 }
 0x265   :  { %931 = vmatprep.subr.mxu0 %v879_v51 }
 0x266   :  { %932 = vmatpush2.msra.mxu0 %v878_v28 }
 0x267   :  { %933 = vmatprep.subr.mxu0 %v877_v52 }
 0x268   :  { %934 = vmatpush2.msra.mxu0 %v876_v53 }
 0x269   :  { %935 = vmatprep.subr.mxu0 %v875_v56 }
 0x26a   :  { %936 = vmatpush2.msra.mxu0 %v874_v57 }
 0x26b   :  { %937 = vmatprep.subr.mxu0 %v873_v44  ;;  %v693_v44 = vsub.s32 4, %v1638_v15 }
 0x26c   :  { %938 = vmatpush2.msra.mxu0 %v872_v58 }
 0x26d   :  { %939 = vmatprep.subr.mxu0 %v871_v37 }
 0x26e   :  { %940 = vmatpush2.msra.mxu0 %v870_v59 }
 0x26f   :  { %941 = vmatprep.subr.mxu0 %v869_v61 }
 0x270   :  { %942 = vmatpush2.msra.mxu0 %v868_v63 }
 0x271   :  { %943 = vmatprep.subr.mxu0 %v867_v2  ;;  %v698_v2 = vrot.slane %v1643_v23, %v693_v44 }
 0x272   :  { %944 = vmatpush2.msra.mxu0 %v866_v45 }
 0x273   :  { %945 = vmatprep.subr.mxu0 %v865_v4  ;;  %v694_v4 = vrot.slane %v1649_v21, %v693_v44 }
 0x274   :  { %946 = vmatpush2.msra.mxu0 %v864_v54  ;;  %v681_v54 = vsub.s32 3, %v1638_v15 }
 0x275   :  { %947 = vmatprep.subr.mxu0 %v863_v62 }
 0x276   :  { %948 = vmatpush2.msra.mxu0 %v862_v7  ;;  %v686_v1 = vrot.slane %v1643_v23, %v681_v54 }
 0x277   :  { %949 = vmatprep.subr.mxu0 %v861_v8 }
 0x278   :  { %950 = vmatpush2.msra.mxu0 %v860_v12 }
 0x283   :  { %v534_v13 = vpop.permute.xlu1 %533 }
 0x284   :  { %v578_v47 = vsel %vm45_vm0, %v1458_v55, %v534_v13  ;;  %v717_v55 = vsub.s32 6, %v1638_v15 }
 0x286   :  { %v532_v10 = vpop.permute.xlu0 %531  ;;  %v722_v24 = vrot.slane %v1643_v23, %v717_v55 }
 0x287   :  { %v542_v9 = vpop.permute.xlu1 %541  ;;  %v577_v40 = vsel %vm45_vm0, %v1442_v3, %v532_v10  ;;  %v718_v3 = vrot.slane %v1649_v21, %v717_v55 }
 0x288   :  { %v581_v27 = vsel %vm579_vm1, %v578_v47, %v542_v9 }
 0x28b   :  { %v540_v14 = vpop.permute.xlu1 %539 }
 0x28c   :  { %v580_v42 = vsel %vm579_vm1, %v577_v40, %v540_v14 }
 0x28f   :  { %v550_v18 = vpop.permute.xlu1 %549 }
 0x290   :  { %v1659_v25 = vsel %vm582_vm2, %v581_v27, %v550_v18 }
 0x291   :  { %v737_v41 = vmul.f32 %v730_v31, %v1659_v25  ;;  %v725_v56 = vmul.f32 %v718_v3, %v1659_v25  ;;  %v701_v18 = vmul.f32 %v694_v4, %v1659_v25 }
 0x293   :  { %v558_v11 = vpop.permute.xlu0 %557 }
 0x294   :  { %v586_v30 = vsel %vm45_vm0, %v1453_v6, %v558_v11  ;;  %v669_v11 = vsub.s32 2, %v1638_v15 }
 0x296   :  { %v674_v27 = vrot.slane %v1643_v23, %v669_v11 }
 0x297   :  { %v566_v22 = vpop.permute.xlu1 %565  ;;  %v556_v35 = vpop.permute.xlu0 %555 }
 0x298   :  { %v588_v33 = vsel %vm579_vm1, %v586_v30, %v566_v22  ;;  %v585_v6 = vsel %vm45_vm0, %v1444_v29, %v556_v35  ;;  %v705_v29 = vsub.s32 5, %v1638_v15 }
 0x29a   :  { %v710_v53 = vrot.slane %v1643_v23, %v705_v29  ;;  %v706_v57 = vrot.slane %v1649_v21, %v705_v29 }
 0x29b   :  { %v574_v34 = vpop.permute.xlu1 %573  ;;  %v564_v20 = vpop.permute.xlu0 %563 }
 0x29c   :  { %v1663_v38 = vsel %vm582_vm2, %v588_v33, %v574_v34  ;;  %v587_v16 = vsel %vm579_vm1, %v585_v6, %v564_v20  ;;  %v713_v45 = vmul.f32 %v706_v57, %v1659_v25  ;;  %v1717_v33 = vsub.s32 1, %v1638_v15 }
 0x29d   :  { %v738_v39 = vmul.f32 %v734_v26, %v1663_v38  ;;  %v726_v52 = vmul.f32 %v722_v24, %v1663_v38  ;;  %v714_v63 = vmul.f32 %v710_v53, %v1663_v38  ;;  %v702_v14 = vmul.f32 %v698_v2, %v1663_v38 }
 0x29f   :  { %v548_v43 = vpop.permute.xlu1 %547  ;;  %739 = vmatprep.subr.mxu1 %v738_v39  ;;  %v572_v46 = vpop.permute.xlu0 %571 }
 0x2a0   :  { %v1676_v48 = vsel %vm582_vm2, %v580_v42, %v548_v43  ;;  %v1679_v49 = vsel %vm582_vm2, %v587_v16, %v572_v46  ;;  %740 = vmatpush1.msra.mxu1 %v737_v41  ;;  %v678_v41 = vmul.f32 %v674_v27, %v1663_v38  ;;  %v662_v42 = vrot.slane %v1643_v23, %v1717_v33 }
 0x2a1   :  { %v736_v50 = vmul.f32 %v734_v26, %v1679_v49  ;;  %v735_v36 = vmul.f32 %v730_v31, %v1676_v48  ;;  %v724_v58 = vmul.f32 %v722_v24, %v1679_v49  ;;  %v723_v37 = vmul.f32 %v718_v3, %v1676_v48 }
 0x2a2   :  { %v712_v62 = vmul.f32 %v710_v53, %v1679_v49  ;;  %v711_v8 = vmul.f32 %v706_v57, %v1676_v48  ;;  %v700_v19 = vmul.f32 %v698_v2, %v1679_v49  ;;  %v699_v22 = vmul.f32 %v694_v4, %v1676_v48  ;;  %v854_v2 = vld [vmem:[%s1822_s1 + $0x110] sm:$0xff]  ;;  %v852_v4 = vld [vmem:[%s1822_s1 + $0x100] sm:$0xff] }
 0x2a3   :  { %v594_v51 = vpop.permute.xlu1 %593  ;;  %741 = vmatprep.subr.mxu1 %v736_v50  ;;  %v614_v28 = vpop.permute.xlu0 %613  ;;  %v690_v26 = vmul.f32 %v686_v1, %v1663_v38  ;;  %v670_v31 = vrot.slane %v1649_v21, %v669_v11  ;;  %v688_v34 = vmul.f32 %v686_v1, %v1679_v49  ;;  %v658_v43 = vrot.slane %v1649_v21, %v1717_v33  ;;  %v21_v1 = vld [vmem:[%s1821_s2 + $0x48] sm:$0xff] }
 0x2a4   :  { %742 = vmatpush1.msra.mxu1 %v735_v36  ;;  %v631_v7 = vsel %vm45_vm0, %v594_v51, %v1399_v5  ;;  %v682_v5 = vrot.slane %v1649_v21, %v681_v54  ;;  %v637_v20 = vsel %vm45_vm0, %v614_v28, %v1430_v17  ;;  %v1731_v17 = vsub.s32 0, %v1638_v15  ;;  %v18_v54 = vld [vmem:[%s1821_s2 + $0x30] sm:$0xff] }
 0x2a5   :  { %743 = vmatprep.subr.mxu1 %v726_v52  ;;  %v677_v16 = vmul.f32 %v670_v31, %v1659_v25  ;;  %v676_v24 = vmul.f32 %v674_v27, %v1679_v49  ;;  %v675_v50 = vmul.f32 %v670_v31, %v1676_v48  ;;  %v666_v52 = vmul.f32 %v662_v42, %v1663_v38 }
 0x2a6   :  { %744 = vmatpush1.msra.mxu1 %v725_v56  ;;  %v689_v30 = vmul.f32 %v682_v5, %v1659_v25  ;;  %v687_v55 = vmul.f32 %v682_v5, %v1676_v48  ;;  %v650_v53 = vrot.slane %v1643_v23, %v1731_v17  ;;  %v646_v57 = vrot.slane %v1649_v21, %v1731_v17  ;;  %v14_v21 = vld [vmem:[%s1821_s2] sm:$0xff] }
 0x2a7   :  { %v600_v59 = vpop.permute.xlu1 %599  ;;  %745 = vmatprep.subr.mxu1 %v724_v58  ;;  %v620_v61 = vpop.permute.xlu0 %619  ;;  %v664_v44 = vmul.f32 %v662_v42, %v1679_v49  ;;  %v663_v58 = vmul.f32 %v658_v43, %v1676_v48 }
 0x2a8   :  { %746 = vmatpush1.msra.mxu1 %v723_v37  ;;  %v633_v12 = vsel %vm579_vm1, %v631_v7, %v600_v59  ;;  %v639_v39 = vsel %vm579_vm1, %v637_v20, %v620_v61  ;;  %v654_v37 = vmul.f32 %v650_v53, %v1663_v38  ;;  %v653_v23 = vmul.f32 %v646_v57, %v1659_v25  ;;  %v15_v38 = vld [vmem:[%s1821_s2 + $0x10] sm:$0xff]  ;;  %v19_v7 = vld [vmem:[%s1821_s2 + $0x38] sm:$0xff] }
 0x2a9   :  { %747 = vmatprep.subr.mxu1 %v714_v63  ;;  %v652_v59 = vmul.f32 %v650_v53, %v1679_v49  ;;  %v651_v61 = vmul.f32 %v646_v57, %v1676_v48  ;;  %v858_v48 = vld [vmem:[%s1822_s1 + $0x130] sm:$0xff]  ;;  %v857_v49 = vld [vmem:[%s1822_s1 + $0x128] sm:$0xff]  ;;  %v855_v63 = vld [vmem:[%s1822_s1 + $0x118] sm:$0xff] }
 0x2aa   :  { %748 = vmatpush1.msra.mxu1 %v713_v45  ;;  %v853_v45 = vld [vmem:[%s1822_s1 + $0x108] sm:$0xff] }
 0x2ab   :  { %v606_v13 = vpop.permute.xlu1 %605  ;;  %749 = vmatprep.subr.mxu1 %v712_v62  ;;  %v616_v9 = vpop.permute.xlu0 %615 }
 0x2ac   :  { %v1705_v10 = vsel %vm582_vm2, %v633_v12, %v606_v13  ;;  %750 = vmatpush1.msra.mxu1 %v711_v8  ;;  %v638_v3 = vsel %vm45_vm0, %v616_v9, %v1425_v32  ;;  %v20_v9 = vld [vmem:[%s1821_s2 + $0x40] sm:$0xff] }
 0x2ad   :  { %751 = vmatprep.subr.mxu1 %v702_v14 }
 0x2ae   :  { %752 = vmatpush1.msra.mxu1 %v701_v18 }
 0x2af   :  { %v596_v35 = vpop.permute.xlu1 %595  ;;  %753 = vmatprep.subr.mxu1 %v700_v19  ;;  %v622_v47 = vpop.permute.xlu0 %621 }
 0x2b0   :  { %754 = vmatpush1.msra.mxu1 %v699_v22  ;;  %v632_v29 = vsel %vm45_vm0, %v596_v35, %v1390_v60  ;;  %v640_v36 = vsel %vm579_vm1, %v638_v3, %v622_v47  ;;  %v665_v60 = vmul.f32 %v658_v43, %v1659_v25  ;;  %v859_v25 = vld [vmem:[%s1822_s1 + $0x138] sm:$0xff] }
 0x2b1   :  { %755 = vmatprep.subr.mxu1 %v690_v26  ;;  %951 = vmatprep.subr.mxu0 %v859_v25  ;;  %v980_v26 = vld [vmem:[%s1821_s2 + $0x91] ss:$8 sm:$0x3] }
 0x2b2   :  { %756 = vmatpush1.msra.mxu1 %v689_v30  ;;  %952 = vmatpush2.msra.mxu0 %v858_v48  ;;  %v888_v27 = vrot.slane %v980_v26, %v1731_v17  ;;  %v892_v30 = vrot.slane %v980_v26, %v1717_v33 }
 0x2b3   :  { %v602_v40 = vpop.permute.xlu1 %601  ;;  %757 = vmatprep.subr.mxu1 %v688_v34  ;;  %v626_v6 = vpop.permute.xlu0 %625  ;;  %953 = vmatprep.subr.mxu0 %v857_v49 }
 0x2b4   :  { %758 = vmatpush1.msra.mxu1 %v687_v55  ;;  %v1734_v46 = vsel %vm582_vm2, %v639_v39, %v626_v6  ;;  %v634_v15 = vsel %vm579_vm1, %v632_v29, %v602_v40 }
 0x2b5   :  { %759 = vmatprep.subr.mxu1 %v678_v41 }
 0x2b6   :  { %760 = vmatpush1.msra.mxu1 %v677_v16 }
 0x2b7   :  { %v608_v51 = vpop.permute.xlu1 %607  ;;  %761 = vmatprep.subr.mxu1 %v676_v24  ;;  %v628_v28 = vpop.permute.xlu0 %627 }
 0x2b8   :  { %v636_v32 = vsel %vm582_vm2, %v634_v15, %v608_v51  ;;  %v642_v56 = vsel %vm582_vm2, %v640_v36, %v628_v28  ;;  %762 = vmatpush1.msra.mxu1 %v675_v50 }
 0x2b9   :  { %763 = vmatprep.subr.mxu1 %v666_v52 }
 0x2ba   :  { %764 = vmatpush1.msra.mxu1 %v665_v60 }
 0x2bb   :  { %765 = vmatprep.subr.mxu1 %v664_v44 }
 0x2bc   :  { %766 = vmatpush1.msra.mxu1 %v663_v58 }
 0x2bd   :  { %767 = vmatprep.subr.mxu1 %v654_v37 }
 0x2be   :  { %768 = vmatpush1.msra.mxu1 %v653_v23 }
 0x2bf   :  { %769 = vmatprep.subr.mxu1 %v652_v59 }
 0x2c0   :  { %770 = vmatpush1.msra.mxu1 %v651_v61 }
 0x2c1   :  { %804 = vmatmul.mubr.f32.vlgmr.msra.gmra.mxu1 %v14_v21 }
 0x2c2   :  { %809 = vmatprep.mubr.f32.mxu1 %v1120_v0  ;;  %v856_v0 = vld [vmem:[%s1822_s1 + $0x120] sm:$0xff] }
 0x2c3   :  { %954 = vmatpush2.msra.mxu0 %v856_v0 }
 0x2c4   :  { %955 = vmatprep.subr.mxu0 %v855_v63 }
 0x2c5   :  { %810 = vmatmul.mubr.f32.gmra.mxu1 %v15_v38  ;;  %956 = vmatpush2.msra.mxu0 %v854_v2 }
 0x2c6   :  { %957 = vmatprep.subr.mxu0 %v853_v45 }
 0x2c7   :  { %958 = vmatpush2.msra.mxu0 %v852_v4 }
 0x381   :  { %v805_v62 = vpop.f32.mrf.mxu1 }
 0x382   :  { %v806_v8 = vadd.f32 %v805_v62, %v18_v54 }
 0x383   :  { %v807_v12 = vpop.f32.mrf.mxu1 }
 0x384   :  { %v808_v13 = vadd.f32 %v807_v12, %v19_v7  ;;  %v816_v5 = vmul.f32 %v806_v8, %v1705_v10 }
 0x385   :  { %v811_v14 = vpop.f32.mrf.mxu1 }
 0x386   :  { %v817_v18 = vmul.f32 %v808_v13, %v1734_v46  ;;  %v812_v11 = vadd.f32 %v811_v14, %v20_v9 }
 0x387   :  { %v813_v19 = vpop.f32.mrf.mxu1 }
 0x388   :  { %v814_v22 = vadd.f32 %v813_v19, %v21_v1  ;;  %959 = vmatprep.mubr.f32.mxu0 %v817_v18  ;;  %v818_v47 = vmul.f32 %v812_v11, %v636_v32 }
 0x389   :  { %960 = vmatmul.mubr.f32.vlgmr.msra.gmra.mxu0 %v816_v5 }
 0x38a   :  { %v819_v35 = vmul.f32 %v814_v22, %v642_v56 }
 0x38c   :  { %965 = vmatprep.mubr.f32.mxu0 %v819_v35 }
 0x38d   :  { %966 = vmatmul.mubr.f32.gmra.mxu0 %v818_v47 }
 0x449   :  { %v961_v31 = vpop.f32.mrf.mxu0 }
 0x44a   :  { %v962_v34 = vadd.f32 %v961_v31, %v888_v27 }
 0x44b   :  { %v963_v10 = vpop.f32.mrf.mxu0 }
 0x44c   :  { %972 = vst [vmem:[%s1823_s3] sm:$0xff] %v962_v34  ;;  %v964_v20 = vadd.f32 %v963_v10, %v892_v30 }
 0x44d   :  { %v967_v55 = vpop.f32.mrf.mxu0 }
 0x44e   :  { %973 = vst [vmem:[%s1823_s3 + $0x8] sm:$0xff] %v964_v20  ;;  %v968_v39 = vadd.f32 %v967_v55, %v888_v27 }
 0x44f   :  { %v969_v40 = vpop.f32.mrf.mxu0 }
 0x450   :  { %974 = vst [vmem:[%s1823_s3 + $0x10] sm:$0xff] %v968_v39  ;;  %v970_v33 = vadd.f32 %v969_v40, %v892_v30 }
 0x452   :  { %975 = vst [vmem:[%s1823_s3 + $0x18] sm:$0xff] %v970_v33 }

</bundles_post_ra>
